<compile_context>
chip_gen: v7x
topology: tpu7x:2x2x1
jax: 0.10.0
libtpu: 0.0.40
codegen_flags: <defaults>
</compile_context>

<pallas_src>
import functools

import jax
import jax.numpy as jnp
import numpy as np
from jax.experimental import pallas as pl
from jax.experimental.pallas import tpu as pltpu


def _layer_norm(x, gamma, beta, eps=1e-5):
    mu = jnp.mean(x, axis=-1, keepdims=True)
    var = jnp.mean(jnp.square(x - mu), axis=-1, keepdims=True)
    return (x - mu) * jax.lax.rsqrt(var + eps) * gamma + beta


def _variance_adaptor_kernel(x_ref, w1_ref, w2_ref, pvec_ref, out_ref,
                             pad1_ref, pad2_ref, *, p):
    f32 = jnp.float32
    R, T, D = x_ref.shape
    K = w1_ref.shape[0]
    F = pad2_ref.shape[1]
    seg = T + 2 * p                      # scratch rows per batch segment
    L = R * seg - 2 * p                  # rows of the slab matmul product

    # Packed parameter rows (each (1, F)): conv1_b, ln1_g, ln1_b,
    # conv2_b, ln2_g, ln2_b, lin_w, lin_b(broadcast).
    pv = pvec_ref[...]
    c1b, g1, be1 = pv[0:1], pv[1:2], pv[2:3]
    c2b, g2, be2 = pv[3:4], pv[4:5], pv[5:6]
    wl, lb = pv[6:7], pv[7:8]

    # ---- stage input into the segmented zero-padded scratch ------------------
    # Layout per batch row r: [0_p | x_r (T rows) | 0_p].  Only the p pad rows
    # are zeroed each step; the interior is always fully overwritten.
    for r in range(R):
        base = r * seg
        pad1_ref[pl.ds(base, p), :] = jnp.zeros((p, D), f32)
        pad1_ref[pl.ds(base + p, T), :] = x_ref[r].astype(f32)
        pad1_ref[pl.ds(base + p + T, p), :] = jnp.zeros((p, D), f32)

    # ---- conv1d #1 : one slab matmul per tap over all rows at once ----------
    # TODO(synk): bf16 operands + im2col single-matmul once channels >= 256.
    h = jnp.dot(pad1_ref[pl.ds(0, L), :], w1_ref[0], preferred_element_type=f32)
    for tap in range(1, K):                                  # K is static
        h = h + jnp.dot(pad1_ref[pl.ds(tap, L), :], w1_ref[tap],
                        preferred_element_type=f32)
    h = h + c1b                                              # bias once
    h = _layer_norm(h, g1, be1)
    h = jnp.maximum(h, 0.0)                                  # ReLU; dropout = id

    # ---- conv1d #2 ----------------------------------------------------------
    for r in range(R):
        base = r * seg
        pad2_ref[pl.ds(base, p), :] = jnp.zeros((p, F), f32)
        pad2_ref[pl.ds(base + p, T), :] = h[base:base + T, :]
        pad2_ref[pl.ds(base + p + T, p), :] = jnp.zeros((p, F), f32)

    h2 = jnp.dot(pad2_ref[pl.ds(0, L), :], w2_ref[0], preferred_element_type=f32)
    for tap in range(1, K):
        h2 = h2 + jnp.dot(pad2_ref[pl.ds(tap, L), :], w2_ref[tap],
                          preferred_element_type=f32)
    h2 = h2 + c2b
    h2 = _layer_norm(h2, g2, be2)
    h2 = jnp.maximum(h2, 0.0)

    # ---- Linear(F -> 1) + ReLU, lane-dense store ------------------------------
    # 1-output-column "matmul" as a lane reduction (XLU), then store with T on
    # the lane axis (no trailing size-1 dim in the output block).
    logit = jnp.sum(h2 * wl, axis=-1, keepdims=True) + lb[:, :1]   # (L, 1)
    rows = [jnp.maximum(logit[r * seg:r * seg + T, 0], 0.0) for r in range(R)]
    out_ref[...] = jnp.stack(rows, axis=0)[:, None, :].astype(out_ref.dtype)


def _default_rows_per_step(batch):
    """Whole batch per grid step on single-TC chips; split rows on v7x (2 TCs)."""
    try:
        kind = jax.devices()[0].device_kind.lower()
    except Exception:
        kind = ""
    if ("v7" in kind or "7x" in kind) and batch >= 2:
        return max(1, batch // 2)
    return batch


def variance_adaptor(encoder_output, params, *, kernel_size, padding,
                     rows_per_step=None):
    """Eval-mode Variance_adaptor forward.  Returns (1, B, T)."""
    B, T, D = encoder_output.shape
    F = params["conv1_b"].shape[0]
    K, p = kernel_size, padding
    assert T + 2 * p - K + 1 == T, "conv kernel/padding must preserve length"

    R = rows_per_step if rows_per_step is not None else _default_rows_per_step(B)
    R = max(1, min(R, B))
    assert B % R == 0, "batch must be divisible by rows_per_step"
    seg = T + 2 * p

    # PyTorch Conv1d weight (C_out, C_in, K) -> (K, C_in, C_out)
    w1_k = jnp.transpose(params["conv1_w"], (2, 1, 0)).astype(jnp.float32)
    w2_k = jnp.transpose(params["conv2_w"], (2, 1, 0)).astype(jnp.float32)
    # All small per-channel vectors packed into one (8, F) table -> one DMA.
    pvec = jnp.stack([
        params["conv1_b"], params["ln1_g"], params["ln1_b"],
        params["conv2_b"], params["ln2_g"], params["ln2_b"],
        params["lin_w"].reshape(-1),
        jnp.broadcast_to(params["lin_b"].reshape(-1), (F,)),
    ], axis=0).astype(jnp.float32)

    kernel_fn = functools.partial(_variance_adaptor_kernel, p=p)

    grid_spec = pltpu.PrefetchScalarGridSpec(
        num_scalar_prefetch=0,
        grid=(B // R,),
        in_specs=[
            pl.BlockSpec((R, T, D), lambda i: (i, 0, 0)),
            pl.BlockSpec(w1_k.shape, lambda i: (0, 0, 0)),
            pl.BlockSpec(w2_k.shape, lambda i: (0, 0, 0)),
            pl.BlockSpec(pvec.shape, lambda i: (0, 0)),
        ],
        out_specs=pl.BlockSpec((R, 1, T), lambda i: (i, 0, 0)),
        scratch_shapes=[pltpu.VMEM((R * seg, D), jnp.float32),
                        pltpu.VMEM((R * seg, F), jnp.float32)],
    )
    out = pl.pallas_call(
        kernel_fn,
        out_shape=jax.ShapeDtypeStruct((B, 1, T), encoder_output.dtype),
        grid_spec=grid_spec,
        compiler_params=pltpu.CompilerParams(
            dimension_semantics=("parallel",)),   # splits rows across v7x's 2 TCs
    )(encoder_output, w1_k, w2_k, pvec)

    # PyTorch: .squeeze() -> (B, T); eval-mode .unsqueeze(0) -> (1, B, T)
    return jnp.transpose(out, (1, 0, 2))


# ----------------------- pure-JAX reference (for validation) -----------------------
def _ref_forward(x, params, *, padding):
    def conv1d(inp_btd, w_oik, b, pad):
        y = jax.lax.conv_general_dilated(
            jnp.transpose(inp_btd, (0, 2, 1)), w_oik, (1,), [(pad, pad)],
            dimension_numbers=("NCH", "OIH", "NCH"))
        return jnp.transpose(y + b[None, :, None], (0, 2, 1))

    def ln(v, g, b):
        mu = jnp.mean(v, -1, keepdims=True)
        var = jnp.mean(jnp.square(v - mu), -1, keepdims=True)
        return (v - mu) / jnp.sqrt(var + 1e-5) * g + b

    h = conv1d(x, params["conv1_w"], params["conv1_b"], padding)
    h = jax.nn.relu(ln(h, params["ln1_g"], params["ln1_b"]))
    h = conv1d(h, params["conv2_w"], params["conv2_b"], padding)
    h = jax.nn.relu(ln(h, params["ln2_g"], params["ln2_b"]))
    out = jax.nn.relu(h @ params["lin_w"].T + params["lin_b"])   # (B, T, 1)
    return jnp.squeeze(out, axis=-1)[None]                       # (1, B, T)


if __name__ == "__main__":
    B, T = 2, 16
    encoder_dim = 32        # model_config['encoder_dim']
    filter_size = 32        # model_config['duration_predictor_filter_size']
    kernel_size = 3         # model_config['duration_predictor_kernel_size']
    padding = 1             # hard-coded padding=1 in the module

    key = jax.random.PRNGKey(0)
    ks = jax.random.split(key, 10)
    f32 = jnp.float32
    n = lambda k_, shape: (0.05 * jax.random.normal(k_, shape)).astype(f32)

    params = {
        # PyTorch Conv1d weight layout: (C_out, C_in, K)
        "conv1_w": n(ks[0], (filter_size, encoder_dim, kernel_size)),
        "conv1_b": n(ks[1], (filter_size,)),
        "ln1_g": (jnp.ones((filter_size,), f32) + n(ks[2], (filter_size,))),
        "ln1_b": n(ks[3], (filter_size,)),
        "conv2_w": n(ks[4], (filter_size, filter_size, kernel_size)),
        "conv2_b": n(ks[5], (filter_size,)),
        "ln2_g": (jnp.ones((filter_size,), f32) + n(ks[6], (filter_size,))),
        "ln2_b": n(ks[7], (filter_size,)),
        # PyTorch Linear(F, 1): weight (1, F), bias (1,)
        "lin_w": n(ks[8], (1, filter_size)),
        "lin_b": n(ks[9], (1,)),
    }

    encoder_output = jax.random.normal(jax.random.PRNGKey(42),
                                       (B, T, encoder_dim), f32)

    out = variance_adaptor(encoder_output, params,
                           kernel_size=kernel_size, padding=padding)
    out = jax.block_until_ready(out)

    ref = _ref_forward(encoder_output, params, padding=padding)
    assert out.shape == (1, B, T)
    np.testing.assert_allclose(np.asarray(out), np.asarray(ref),
                               rtol=2e-3, atol=2e-3)
    print("KERNEL_OK")
</pallas_src>

<mosaic_0001>
module attributes {stable_mosaic.version = 11 : i64} {
  func.func @_variance_adaptor_kernel(%arg0: i32, %arg1: memref<2x16x32xf32, #tpu.memory_space<vmem>>, %arg2: memref<3x32x32xf32, #tpu.memory_space<vmem>>, %arg3: memref<3x32x32xf32, #tpu.memory_space<vmem>>, %arg4: memref<8x32xf32, #tpu.memory_space<vmem>>, %arg5: memref<2x1x16xf32, #tpu.memory_space<vmem>>, %arg6: memref<36x32xf32, #tpu.memory_space<vmem>>, %arg7: memref<36x32xf32, #tpu.memory_space<vmem>>) attributes {dimension_semantics = [#tpu.dimension_semantics<parallel>], iteration_bounds = array<i64: 1>, scalar_prefetch = 0 : i64, scratch_operands = 2 : i64, tpu.core_type = #tpu.core_type<tc>, window_params = [{transform_indices = @transform_0, window_bounds = array<i64: 2, 16, 32>}, {pipeline_mode = #tpu.pipeline_mode<synchronous>, transform_indices = @transform_1, window_bounds = array<i64: 3, 32, 32>}, {pipeline_mode = #tpu.pipeline_mode<synchronous>, transform_indices = @transform_2, window_bounds = array<i64: 3, 32, 32>}, {pipeline_mode = #tpu.pipeline_mode<synchronous>, transform_indices = @transform_3, window_bounds = array<i64: 8, 32>}, {transform_indices = @transform_4, window_bounds = array<i64: 2, 1, 16>}]} {
    %c0 = arith.constant 0 : index
    %c0_0 = arith.constant 0 : index
    %0 = vector.load %arg4[%c0, %c0_0] : memref<8x32xf32, #tpu.memory_space<vmem>>, vector<8x32xf32>
    %1 = vector.extract_strided_slice %0 {offsets = [0, 0], sizes = [1, 32], strides = [1, 1]} : vector<8x32xf32> to vector<1x32xf32>
    %2 = vector.extract_strided_slice %0 {offsets = [1, 0], sizes = [1, 32], strides = [1, 1]} : vector<8x32xf32> to vector<1x32xf32>
    %3 = vector.extract_strided_slice %0 {offsets = [2, 0], sizes = [1, 32], strides = [1, 1]} : vector<8x32xf32> to vector<1x32xf32>
    %4 = vector.extract_strided_slice %0 {offsets = [3, 0], sizes = [1, 32], strides = [1, 1]} : vector<8x32xf32> to vector<1x32xf32>
    %5 = vector.extract_strided_slice %0 {offsets = [4, 0], sizes = [1, 32], strides = [1, 1]} : vector<8x32xf32> to vector<1x32xf32>
    %6 = vector.extract_strided_slice %0 {offsets = [5, 0], sizes = [1, 32], strides = [1, 1]} : vector<8x32xf32> to vector<1x32xf32>
    %7 = vector.extract_strided_slice %0 {offsets = [6, 0], sizes = [1, 32], strides = [1, 1]} : vector<8x32xf32> to vector<1x32xf32>
    %8 = vector.extract_strided_slice %0 {offsets = [7, 0], sizes = [1, 32], strides = [1, 1]} : vector<8x32xf32> to vector<1x32xf32>
    %cst = arith.constant 0.000000e+00 : f32
    %9 = vector.broadcast %cst : f32 to vector<1x32xf32>
    %c0_1 = arith.constant 0 : index
    %c0_2 = arith.constant 0 : index
    %10 = vector.load %arg6[%c0_1, %c0_2] : memref<36x32xf32, #tpu.memory_space<vmem>>, vector<1x32xf32>
    tpu.vector_store %arg6[%c0_1, %c0_2], %9 {strides = array<i32>} : memref<36x32xf32, #tpu.memory_space<vmem>>, vector<1x32xf32>,
    %c0_3 = arith.constant 0 : index
    %c0_4 = arith.constant 0 : index
    %c0_5 = arith.constant 0 : index
    %11 = vector.load %arg1[%c0_3, %c0_4, %c0_5] : memref<2x16x32xf32, #tpu.memory_space<vmem>>, vector<1x16x32xf32>
    %12 = vector.shape_cast %11 : vector<1x16x32xf32> to vector<16x32xf32>
    %c1 = arith.constant 1 : index
    %c0_6 = arith.constant 0 : index
    %13 = vector.load %arg6[%c1, %c0_6] : memref<36x32xf32, #tpu.memory_space<vmem>>, vector<16x32xf32>
    tpu.vector_store %arg6[%c1, %c0_6], %12 {strides = array<i32>} : memref<36x32xf32, #tpu.memory_space<vmem>>, vector<16x32xf32>,
    %cst_7 = arith.constant 0.000000e+00 : f32
    %14 = vector.broadcast %cst_7 : f32 to vector<1x32xf32>
    %c17 = arith.constant 17 : index
    %c0_8 = arith.constant 0 : index
    %15 = vector.load %arg6[%c17, %c0_8] : memref<36x32xf32, #tpu.memory_space<vmem>>, vector<1x32xf32>
    tpu.vector_store %arg6[%c17, %c0_8], %14 {strides = array<i32>} : memref<36x32xf32, #tpu.memory_space<vmem>>, vector<1x32xf32>,
    %cst_9 = arith.constant 0.000000e+00 : f32
    %16 = vector.broadcast %cst_9 : f32 to vector<1x32xf32>
    %c18 = arith.constant 18 : index
    %c0_10 = arith.constant 0 : index
    %17 = vector.load %arg6[%c18, %c0_10] : memref<36x32xf32, #tpu.memory_space<vmem>>, vector<1x32xf32>
    tpu.vector_store %arg6[%c18, %c0_10], %16 {strides = array<i32>} : memref<36x32xf32, #tpu.memory_space<vmem>>, vector<1x32xf32>,
    %c1_11 = arith.constant 1 : index
    %c0_12 = arith.constant 0 : index
    %c0_13 = arith.constant 0 : index
    %18 = vector.load %arg1[%c1_11, %c0_12, %c0_13] : memref<2x16x32xf32, #tpu.memory_space<vmem>>, vector<1x16x32xf32>
    %19 = vector.shape_cast %18 : vector<1x16x32xf32> to vector<16x32xf32>
    %c19 = arith.constant 19 : index
    %c0_14 = arith.constant 0 : index
    %20 = vector.load %arg6[%c19, %c0_14] : memref<36x32xf32, #tpu.memory_space<vmem>>, vector<16x32xf32>
    tpu.vector_store %arg6[%c19, %c0_14], %19 {strides = array<i32>} : memref<36x32xf32, #tpu.memory_space<vmem>>, vector<16x32xf32>,
    %cst_15 = arith.constant 0.000000e+00 : f32
    %21 = vector.broadcast %cst_15 : f32 to vector<1x32xf32>
    %c35 = arith.constant 35 : index
    %c0_16 = arith.constant 0 : index
    %22 = vector.load %arg6[%c35, %c0_16] : memref<36x32xf32, #tpu.memory_space<vmem>>, vector<1x32xf32>
    tpu.vector_store %arg6[%c35, %c0_16], %21 {strides = array<i32>} : memref<36x32xf32, #tpu.memory_space<vmem>>, vector<1x32xf32>,
    %c0_17 = arith.constant 0 : index
    %c0_18 = arith.constant 0 : index
    %23 = vector.load %arg6[%c0_17, %c0_18] : memref<36x32xf32, #tpu.memory_space<vmem>>, vector<34x32xf32>
    %c0_19 = arith.constant 0 : index
    %c0_20 = arith.constant 0 : index
    %c0_21 = arith.constant 0 : index
    %24 = vector.load %arg2[%c0_19, %c0_20, %c0_21] : memref<3x32x32xf32, #tpu.memory_space<vmem>>, vector<1x32x32xf32>
    %25 = vector.shape_cast %24 : vector<1x32x32xf32> to vector<32x32xf32>
    %cst_22 = arith.constant dense<0.000000e+00> : vector<34x32xf32>
    %26 = tpu.matmul %23, %25, %cst_22 {dimension_numbers = #tpu.dot_dimension_numbers<[1], [0], [0], [1], [0, 0, 1, 1], [], []>} : vector<34x32xf32>, vector<32x32xf32>, vector<34x32xf32> -> vector<34x32xf32>
    %c1_23 = arith.constant 1 : index
    %c0_24 = arith.constant 0 : index
    %27 = vector.load %arg6[%c1_23, %c0_24] : memref<36x32xf32, #tpu.memory_space<vmem>>, vector<34x32xf32>
    %c1_25 = arith.constant 1 : index
    %c0_26 = arith.constant 0 : index
    %c0_27 = arith.constant 0 : index
    %28 = vector.load %arg2[%c1_25, %c0_26, %c0_27] : memref<3x32x32xf32, #tpu.memory_space<vmem>>, vector<1x32x32xf32>
    %29 = vector.shape_cast %28 : vector<1x32x32xf32> to vector<32x32xf32>
    %cst_28 = arith.constant dense<0.000000e+00> : vector<34x32xf32>
    %30 = tpu.matmul %27, %29, %cst_28 {dimension_numbers = #tpu.dot_dimension_numbers<[1], [0], [0], [1], [0, 0, 1, 1], [], []>} : vector<34x32xf32>, vector<32x32xf32>, vector<34x32xf32> -> vector<34x32xf32>
    %31 = arith.addf %26, %30 : vector<34x32xf32>
    %c2 = arith.constant 2 : index
    %c0_29 = arith.constant 0 : index
    %32 = vector.load %arg6[%c2, %c0_29] : memref<36x32xf32, #tpu.memory_space<vmem>>, vector<34x32xf32>
    %c2_30 = arith.constant 2 : index
    %c0_31 = arith.constant 0 : index
    %c0_32 = arith.constant 0 : index
    %33 = vector.load %arg2[%c2_30, %c0_31, %c0_32] : memref<3x32x32xf32, #tpu.memory_space<vmem>>, vector<1x32x32xf32>
    %34 = vector.shape_cast %33 : vector<1x32x32xf32> to vector<32x32xf32>
    %cst_33 = arith.constant dense<0.000000e+00> : vector<34x32xf32>
    %35 = tpu.matmul %32, %34, %cst_33 {dimension_numbers = #tpu.dot_dimension_numbers<[1], [0], [0], [1], [0, 0, 1, 1], [], []>} : vector<34x32xf32>, vector<32x32xf32>, vector<34x32xf32> -> vector<34x32xf32>
    %36 = arith.addf %31, %35 : vector<34x32xf32>
    %37 = vector.broadcast %1 : vector<1x32xf32> to vector<34x32xf32>
    %38 = arith.addf %36, %37 : vector<34x32xf32>
    %cst_34 = arith.constant dense<0.000000e+00> : vector<34xf32>
    %39 = vector.multi_reduction <add>, %38, %cst_34 [1] : vector<34x32xf32> to vector<34xf32>
    %40 = vector.shape_cast %39 : vector<34xf32> to vector<34x1xf32>
    %cst_35 = arith.constant 3.200000e+01 : f32
    %41 = vector.broadcast %cst_35 : f32 to vector<34x1xf32>
    %42 = arith.divf %40, %41 : vector<34x1xf32>
    %43 = vector.broadcast %42 : vector<34x1xf32> to vector<34x32xf32>
    %44 = arith.subf %38, %43 : vector<34x32xf32>
    %45 = arith.mulf %44, %44 : vector<34x32xf32>
    %cst_36 = arith.constant dense<0.000000e+00> : vector<34xf32>
    %46 = vector.multi_reduction <add>, %45, %cst_36 [1] : vector<34x32xf32> to vector<34xf32>
    %47 = vector.shape_cast %46 : vector<34xf32> to vector<34x1xf32>
    %cst_37 = arith.constant 3.200000e+01 : f32
    %48 = vector.broadcast %cst_37 : f32 to vector<34x1xf32>
    %49 = arith.divf %47, %48 : vector<34x1xf32>
    %50 = vector.broadcast %42 : vector<34x1xf32> to vector<34x32xf32>
    %51 = arith.subf %38, %50 : vector<34x32xf32>
    %cst_38 = arith.constant 9.99999974E-6 : f32
    %52 = vector.broadcast %cst_38 : f32 to vector<34x1xf32>
    %53 = arith.addf %49, %52 : vector<34x1xf32>
    %54 = math.rsqrt %53 : vector<34x1xf32>
    %55 = vector.broadcast %54 : vector<34x1xf32> to vector<34x32xf32>
    %56 = arith.mulf %51, %55 : vector<34x32xf32>
    %57 = vector.broadcast %2 : vector<1x32xf32> to vector<34x32xf32>
    %58 = arith.mulf %56, %57 : vector<34x32xf32>
    %59 = vector.broadcast %3 : vector<1x32xf32> to vector<34x32xf32>
    %60 = arith.addf %58, %59 : vector<34x32xf32>
    %cst_39 = arith.constant 0.000000e+00 : f32
    %61 = vector.broadcast %cst_39 : f32 to vector<34x32xf32>
    %62 = arith.maximumf %60, %61 : vector<34x32xf32>
    %cst_40 = arith.constant 0.000000e+00 : f32
    %63 = vector.broadcast %cst_40 : f32 to vector<1x32xf32>
    %c0_41 = arith.constant 0 : index
    %c0_42 = arith.constant 0 : index
    %64 = vector.load %arg7[%c0_41, %c0_42] : memref<36x32xf32, #tpu.memory_space<vmem>>, vector<1x32xf32>
    tpu.vector_store %arg7[%c0_41, %c0_42], %63 {strides = array<i32>} : memref<36x32xf32, #tpu.memory_space<vmem>>, vector<1x32xf32>,
    %65 = vector.extract_strided_slice %62 {offsets = [0, 0], sizes = [16, 32], strides = [1, 1]} : vector<34x32xf32> to vector<16x32xf32>
    %c1_43 = arith.constant 1 : index
    %c0_44 = arith.constant 0 : index
    %66 = vector.load %arg7[%c1_43, %c0_44] : memref<36x32xf32, #tpu.memory_space<vmem>>, vector<16x32xf32>
    tpu.vector_store %arg7[%c1_43, %c0_44], %65 {strides = array<i32>} : memref<36x32xf32, #tpu.memory_space<vmem>>, vector<16x32xf32>,
    %cst_45 = arith.constant 0.000000e+00 : f32
    %67 = vector.broadcast %cst_45 : f32 to vector<1x32xf32>
    %c17_46 = arith.constant 17 : index
    %c0_47 = arith.constant 0 : index
    %68 = vector.load %arg7[%c17_46, %c0_47] : memref<36x32xf32, #tpu.memory_space<vmem>>, vector<1x32xf32>
    tpu.vector_store %arg7[%c17_46, %c0_47], %67 {strides = array<i32>} : memref<36x32xf32, #tpu.memory_space<vmem>>, vector<1x32xf32>,
    %cst_48 = arith.constant 0.000000e+00 : f32
    %69 = vector.broadcast %cst_48 : f32 to vector<1x32xf32>
    %c18_49 = arith.constant 18 : index
    %c0_50 = arith.constant 0 : index
    %70 = vector.load %arg7[%c18_49, %c0_50] : memref<36x32xf32, #tpu.memory_space<vmem>>, vector<1x32xf32>
    tpu.vector_store %arg7[%c18_49, %c0_50], %69 {strides = array<i32>} : memref<36x32xf32, #tpu.memory_space<vmem>>, vector<1x32xf32>,
    %71 = vector.extract_strided_slice %62 {offsets = [18, 0], sizes = [16, 32], strides = [1, 1]} : vector<34x32xf32> to vector<16x32xf32>
    %c19_51 = arith.constant 19 : index
    %c0_52 = arith.constant 0 : index
    %72 = vector.load %arg7[%c19_51, %c0_52] : memref<36x32xf32, #tpu.memory_space<vmem>>, vector<16x32xf32>
    tpu.vector_store %arg7[%c19_51, %c0_52], %71 {strides = array<i32>} : memref<36x32xf32, #tpu.memory_space<vmem>>, vector<16x32xf32>,
    %cst_53 = arith.constant 0.000000e+00 : f32
    %73 = vector.broadcast %cst_53 : f32 to vector<1x32xf32>
    %c35_54 = arith.constant 35 : index
    %c0_55 = arith.constant 0 : index
    %74 = vector.load %arg7[%c35_54, %c0_55] : memref<36x32xf32, #tpu.memory_space<vmem>>, vector<1x32xf32>
    tpu.vector_store %arg7[%c35_54, %c0_55], %73 {strides = array<i32>} : memref<36x32xf32, #tpu.memory_space<vmem>>, vector<1x32xf32>,
    %c0_56 = arith.constant 0 : index
    %c0_57 = arith.constant 0 : index
    %75 = vector.load %arg7[%c0_56, %c0_57] : memref<36x32xf32, #tpu.memory_space<vmem>>, vector<34x32xf32>
    %c0_58 = arith.constant 0 : index
    %c0_59 = arith.constant 0 : index
    %c0_60 = arith.constant 0 : index
    %76 = vector.load %arg3[%c0_58, %c0_59, %c0_60] : memref<3x32x32xf32, #tpu.memory_space<vmem>>, vector<1x32x32xf32>
    %77 = vector.shape_cast %76 : vector<1x32x32xf32> to vector<32x32xf32>
    %cst_61 = arith.constant dense<0.000000e+00> : vector<34x32xf32>
    %78 = tpu.matmul %75, %77, %cst_61 {dimension_numbers = #tpu.dot_dimension_numbers<[1], [0], [0], [1], [0, 0, 1, 1], [], []>} : vector<34x32xf32>, vector<32x32xf32>, vector<34x32xf32> -> vector<34x32xf32>
    %c1_62 = arith.constant 1 : index
    %c0_63 = arith.constant 0 : index
    %79 = vector.load %arg7[%c1_62, %c0_63] : memref<36x32xf32, #tpu.memory_space<vmem>>, vector<34x32xf32>
    %c1_64 = arith.constant 1 : index
    %c0_65 = arith.constant 0 : index
    %c0_66 = arith.constant 0 : index
    %80 = vector.load %arg3[%c1_64, %c0_65, %c0_66] : memref<3x32x32xf32, #tpu.memory_space<vmem>>, vector<1x32x32xf32>
    %81 = vector.shape_cast %80 : vector<1x32x32xf32> to vector<32x32xf32>
    %cst_67 = arith.constant dense<0.000000e+00> : vector<34x32xf32>
    %82 = tpu.matmul %79, %81, %cst_67 {dimension_numbers = #tpu.dot_dimension_numbers<[1], [0], [0], [1], [0, 0, 1, 1], [], []>} : vector<34x32xf32>, vector<32x32xf32>, vector<34x32xf32> -> vector<34x32xf32>
    %83 = arith.addf %78, %82 : vector<34x32xf32>
    %c2_68 = arith.constant 2 : index
    %c0_69 = arith.constant 0 : index
    %84 = vector.load %arg7[%c2_68, %c0_69] : memref<36x32xf32, #tpu.memory_space<vmem>>, vector<34x32xf32>
    %c2_70 = arith.constant 2 : index
    %c0_71 = arith.constant 0 : index
    %c0_72 = arith.constant 0 : index
    %85 = vector.load %arg3[%c2_70, %c0_71, %c0_72] : memref<3x32x32xf32, #tpu.memory_space<vmem>>, vector<1x32x32xf32>
    %86 = vector.shape_cast %85 : vector<1x32x32xf32> to vector<32x32xf32>
    %cst_73 = arith.constant dense<0.000000e+00> : vector<34x32xf32>
    %87 = tpu.matmul %84, %86, %cst_73 {dimension_numbers = #tpu.dot_dimension_numbers<[1], [0], [0], [1], [0, 0, 1, 1], [], []>} : vector<34x32xf32>, vector<32x32xf32>, vector<34x32xf32> -> vector<34x32xf32>
    %88 = arith.addf %83, %87 : vector<34x32xf32>
    %89 = vector.broadcast %4 : vector<1x32xf32> to vector<34x32xf32>
    %90 = arith.addf %88, %89 : vector<34x32xf32>
    %cst_74 = arith.constant dense<0.000000e+00> : vector<34xf32>
    %91 = vector.multi_reduction <add>, %90, %cst_74 [1] : vector<34x32xf32> to vector<34xf32>
    %92 = vector.shape_cast %91 : vector<34xf32> to vector<34x1xf32>
    %cst_75 = arith.constant 3.200000e+01 : f32
    %93 = vector.broadcast %cst_75 : f32 to vector<34x1xf32>
    %94 = arith.divf %92, %93 : vector<34x1xf32>
    %95 = vector.broadcast %94 : vector<34x1xf32> to vector<34x32xf32>
    %96 = arith.subf %90, %95 : vector<34x32xf32>
    %97 = arith.mulf %96, %96 : vector<34x32xf32>
    %cst_76 = arith.constant dense<0.000000e+00> : vector<34xf32>
    %98 = vector.multi_reduction <add>, %97, %cst_76 [1] : vector<34x32xf32> to vector<34xf32>
    %99 = vector.shape_cast %98 : vector<34xf32> to vector<34x1xf32>
    %cst_77 = arith.constant 3.200000e+01 : f32
    %100 = vector.broadcast %cst_77 : f32 to vector<34x1xf32>
    %101 = arith.divf %99, %100 : vector<34x1xf32>
    %102 = vector.broadcast %94 : vector<34x1xf32> to vector<34x32xf32>
    %103 = arith.subf %90, %102 : vector<34x32xf32>
    %cst_78 = arith.constant 9.99999974E-6 : f32
    %104 = vector.broadcast %cst_78 : f32 to vector<34x1xf32>
    %105 = arith.addf %101, %104 : vector<34x1xf32>
    %106 = math.rsqrt %105 : vector<34x1xf32>
    %107 = vector.broadcast %106 : vector<34x1xf32> to vector<34x32xf32>
    %108 = arith.mulf %103, %107 : vector<34x32xf32>
    %109 = vector.broadcast %5 : vector<1x32xf32> to vector<34x32xf32>
    %110 = arith.mulf %108, %109 : vector<34x32xf32>
    %111 = vector.broadcast %6 : vector<1x32xf32> to vector<34x32xf32>
    %112 = arith.addf %110, %111 : vector<34x32xf32>
    %cst_79 = arith.constant 0.000000e+00 : f32
    %113 = vector.broadcast %cst_79 : f32 to vector<34x32xf32>
    %114 = arith.maximumf %112, %113 : vector<34x32xf32>
    %115 = vector.broadcast %7 : vector<1x32xf32> to vector<34x32xf32>
    %116 = arith.mulf %114, %115 : vector<34x32xf32>
    %cst_80 = arith.constant dense<0.000000e+00> : vector<34xf32>
    %117 = vector.multi_reduction <add>, %116, %cst_80 [1] : vector<34x32xf32> to vector<34xf32>
    %118 = vector.shape_cast %117 : vector<34xf32> to vector<34x1xf32>
    %119 = vector.extract_strided_slice %8 {offsets = [0, 0], sizes = [1, 1], strides = [1, 1]} : vector<1x32xf32> to vector<1x1xf32>
    %120 = vector.broadcast %119 : vector<1x1xf32> to vector<34x1xf32>
    %121 = arith.addf %118, %120 : vector<34x1xf32>
    %122 = vector.extract_strided_slice %121 {offsets = [0, 0], sizes = [16, 1], strides = [1, 1]} : vector<34x1xf32> to vector<16x1xf32>
    %123 = vector.shape_cast %122 : vector<16x1xf32> to vector<16xf32>
    %cst_81 = arith.constant 0.000000e+00 : f32
    %124 = vector.broadcast %cst_81 : f32 to vector<16xf32>
    %125 = arith.maximumf %123, %124 : vector<16xf32>
    %126 = vector.extract_strided_slice %121 {offsets = [18, 0], sizes = [16, 1], strides = [1, 1]} : vector<34x1xf32> to vector<16x1xf32>
    %127 = vector.shape_cast %126 : vector<16x1xf32> to vector<16xf32>
    %cst_82 = arith.constant 0.000000e+00 : f32
    %128 = vector.broadcast %cst_82 : f32 to vector<16xf32>
    %129 = arith.maximumf %127, %128 : vector<16xf32>
    %130 = vector.shape_cast %125 : vector<16xf32> to vector<1x16xf32>
    %131 = vector.shape_cast %129 : vector<16xf32> to vector<1x16xf32>
    %132 = tpu.concatenate %130, %131 in 0 : vector<1x16xf32>, vector<1x16xf32> -> vector<2x16xf32>
    %133 = vector.shape_cast %132 : vector<2x16xf32> to vector<2x1x16xf32>
    %c0_83 = arith.constant 0 : index
    %c0_84 = arith.constant 0 : index
    %c0_85 = arith.constant 0 : index
    %134 = vector.load %arg5[%c0_83, %c0_84, %c0_85] : memref<2x1x16xf32, #tpu.memory_space<vmem>>, vector<2x1x16xf32>
    tpu.vector_store %arg5[%c0_83, %c0_84, %c0_85], %133 {strides = array<i32>} : memref<2x1x16xf32, #tpu.memory_space<vmem>>, vector<2x1x16xf32>,
    return
  }
  func.func @transform_0(%arg0: i32) -> (i32, i32, i32) {
    %c0_i32 = arith.constant 0 : i32
    %c0_i32_0 = arith.constant 0 : i32
    %c0_i32_1 = arith.constant 0 : i32
    return %arg0, %c0_i32, %c0_i32_0 : i32, i32, i32
  }
  func.func @transform_1(%arg0: i32) -> (i32, i32, i32) {
    %c0_i32 = arith.constant 0 : i32
    %c0_i32_0 = arith.constant 0 : i32
    %c0_i32_1 = arith.constant 0 : i32
    %c0_i32_2 = arith.constant 0 : i32
    return %c0_i32, %c0_i32_0, %c0_i32_1 : i32, i32, i32
  }
  func.func @transform_2(%arg0: i32) -> (i32, i32, i32) {
    %c0_i32 = arith.constant 0 : i32
    %c0_i32_0 = arith.constant 0 : i32
    %c0_i32_1 = arith.constant 0 : i32
    %c0_i32_2 = arith.constant 0 : i32
    return %c0_i32, %c0_i32_0, %c0_i32_1 : i32, i32, i32
  }
  func.func @transform_3(%arg0: i32) -> (i32, i32) {
    %c0_i32 = arith.constant 0 : i32
    %c0_i32_0 = arith.constant 0 : i32
    %c0_i32_1 = arith.constant 0 : i32
    return %c0_i32, %c0_i32_0 : i32, i32
  }
  func.func @transform_4(%arg0: i32) -> (i32, i32, i32) {
    %c0_i32 = arith.constant 0 : i32
    %c0_i32_0 = arith.constant 0 : i32
    %c0_i32_1 = arith.constant 0 : i32
    return %arg0, %c0_i32, %c0_i32_0 : i32, i32, i32
  }
}

</mosaic_0001>

<bundles_post_ra>
// kernel: tpu_custom_call.1
= control target key start
LH: loop header
LB: loop body
LE: loop exit
PB: predicated region body
PF: predicated region fallthrough
CT: control target
= control target key end

     0   :  { %9 = vsyncpa [#allocation5], 0  ;;  %s1807_s0 = inlined_call_operand.hbm [shape: f32[2,16,32], index: 0, kind: input, shape index: {}]   ;;  %s1808_s1 = inlined_call_operand.hbm [shape: f32[3,32,32], index: 1, kind: input, shape index: {}]   ;;  %s1809_s2 = inlined_call_operand.hbm [shape: f32[3,32,32], index: 2, kind: input, shape index: {}]   ;;  %s1810_s3 = inlined_call_operand.vmem [shape: f32[8,32], index: 3, kind: input, shape index: {}]   ;;  %s1811_s4 = inlined_call_operand.hbm [shape: f32[2,1,16], index: 4, kind: output, shape index: {}]  }
   0x1   :  { %10 = vsyncpa [#allocation8], 0 }
   0x2   :  { %11 = vsyncpa [#allocation6], 0  ;;  %s1506_s15 = smov [#allocation7]   ;;  %s1507_s17 = smov [#allocation4]  }
   0x3   :  { %s29_s16 = sshll.u32 %s1506_s15, 4  ;;  %s17_s18 = sshll.u32 %s1507_s17, 4  ;;  %s30_s16 = int_to_ptr.vmem [resolvable:$true] %s29_s16  ;;  %s1544_s18 = int_to_ptr.vmem [resolvable:$true] %s17_s18 }
   0x4   :  { %s1412_s21 = scalar_lea.hbm %s1808_s1, 1536 }
   0x5   :  { %p1413_p0 = scmp.ne.s32.totalorder %s1808_s1, %s1412_s21  ;;  %p1416_p1 = scmp.lt.u32.totalorder %s1412_s21, %s1808_s1 }
   0x7   :  { %p1418_p2 = pnand %p1416_p1, %p1413_p0 }
   0x9   :  { %1421 = shalt.err (!%p1418_p2)
}
   0xa   :  { %s1422_s26 = scalar_lea.vmem %s30_s16, 1536  ;;  %p1427_p4 = scmp.lt.s32.totalorder %s30_s16, %s30_s16 }
   0xb   :  { %p1423_p3 = scmp.ne.s32.totalorder %s30_s16, %s1422_s26  ;;  %p1428_p5 = scmp.lt.s32.totalorder %s1422_s26, %s1422_s26 }
   0xd   :  { %p1429_p6 = por %p1428_p5, %p1427_p4 }
   0xf   :  { %p1430_p7 = pnand %p1429_p6, %p1423_p3 }
  0x11   :  { %1433 = shalt.err (!%p1430_p7)
}
  0x12   :  { %s1508_s27 = smov 128   ;;  %s1509_s28 = smov 8  }
  0x13   :  { %35 = dma.hbm_to_vmem [thread:$0]  %s1808_s1, 1536, %s30_s16, [#allocation8], %s1508_s27, %s1508_s27, %s1509_s28  }
  0x14   :  { %s1434_s7 = scalar_lea.hbm %s1807_s0, 512 }
  0x15   :  { %p1435_p8 = scmp.ne.s32.totalorder %s1807_s0, %s1434_s7  ;;  %p1438_p9 = scmp.lt.u32.totalorder %s1434_s7, %s1807_s0 }
  0x17   :  { %p1440_p10 = pnand %p1438_p9, %p1435_p8 }
  0x19   :  { %1443 = shalt.err (!%p1440_p10)
}
  0x1a   :  { %s1444_s12 = scalar_lea.vmem %s1544_s18, 512  ;;  %p1449_p12 = scmp.lt.s32.totalorder %s1544_s18, %s1544_s18 }
  0x1b   :  { %p1445_p11 = scmp.ne.s32.totalorder %s1544_s18, %s1444_s12  ;;  %p1450_p13 = scmp.lt.s32.totalorder %s1444_s12, %s1444_s12 }
  0x1d   :  { %p1451_p0 = por %p1450_p13, %p1449_p12 }
  0x1f   :  { %p1452_p1 = pnand %p1451_p0, %p1445_p11 }
  0x21   :  { %1455 = shalt.err (!%p1452_p1)
}
  0x22   :  { %23 = dma.hbm_to_vmem [thread:$0]  %s1807_s0, 512, %s1544_s18, [#allocation5], %s1508_s27, %s1508_s27, %s1509_s28  }
  0x23   :  { %s1510_s14 = smov [#allocation9]   ;;  %s1456_s19 = scalar_lea.hbm %s1809_s2, 1536 }
  0x24   :  { %s41_s15 = sshll.u32 %s1510_s14, 4  ;;  %p1457_p2 = scmp.ne.s32.totalorder %s1809_s2, %s1456_s19  ;;  %s42_s15 = int_to_ptr.vmem [resolvable:$true] %s41_s15 }
  0x25   :  { %p1460_p3 = scmp.lt.u32.totalorder %s1456_s19, %s1809_s2 }
  0x27   :  { %p1462_p4 = pnand %p1460_p3, %p1457_p2 }
  0x29   :  { %1465 = shalt.err (!%p1462_p4)
}
  0x2a   :  { %s1466_s24 = scalar_lea.vmem %s42_s15, 1536  ;;  %p1471_p6 = scmp.lt.s32.totalorder %s42_s15, %s42_s15 }
  0x2b   :  { %p1467_p5 = scmp.ne.s32.totalorder %s42_s15, %s1466_s24  ;;  %p1472_p7 = scmp.lt.s32.totalorder %s1466_s24, %s1466_s24 }
  0x2d   :  { %p1473_p8 = por %p1472_p7, %p1471_p6 }
  0x2f   :  { %p1474_p9 = pnand %p1473_p8, %p1467_p5 }
  0x31   :  { %1477 = shalt.err (!%p1474_p9)
}
  0x32   :  { %47 = dma.hbm_to_vmem [thread:$0]  %s1809_s2, 1536, %s42_s15, [#allocation8], %s1508_s27, %s1508_s27, %s1509_s28  }
  0x33   :  { %1500 = dma.done.wait [#allocation5], 512  }
  0x34   :  { %1501 = vsyncadd [#allocation5], 4294966784 }
  0x35   :  { %1502 = dma.done.wait [#allocation8], 3072  }
  0x36   :  { %1503 = vsyncadd [#allocation8], 4294964224  ;;  %v1511_v0 = vmov 0.0|0.0   ;;  %vm60_vm0 = vcmask 253952   ;;  %vm1512_vm1 = vmmov 0   ;;  %v1513_v1 = vmov 0.0  }
  0x37   :  { %1341 = vmatprep.subr.bf16.mxu0 %v1511_v0  ;;  %1347 = vmatprep.subr.bf16.mxu1 %v1511_v0  ;;  %61 = vst.msk [vmem:[#allocation2] sm:$0x1] %vm60_vm0, %v1513_v1  ;;  %67 = vst.msk [vmem:[#allocation2 + $0x11] sm:$0x1] %vm60_vm0, %v1513_v1  ;;  %v90_v2 = vld [vmem:[#allocation7 + $0x20] sm:$0xff]  ;;  %v91_v3 = vld [vmem:[#allocation7 + $0x28] sm:$0xff]  ;;  %v424_v49 = vlaneseq }
  0x38   :  { %1211 = vmatprep.mubr.msk.f32.mxu0 %vm1512_vm1, %v1513_v1  ;;  %1234 = vmatprep.mubr.msk.f32.mxu1 %vm1512_vm1, %v1513_v1  ;;  %68 = vst.msk [vmem:[#allocation2 + $0x12] sm:$0x1] %vm60_vm0, %v1513_v1  ;;  %74 = vst.msk [vmem:[#allocation2 + $0x23] sm:$0x1] %vm60_vm0, %v1513_v1  ;;  %v80_v4 = vld [vmem:[#allocation7] sm:$0xff]  ;;  %vm64_vm2 = vcmask 261120   ;;  %v1342_v5 = vpack.c.bf16 %v91_v3, %v90_v2 }
  0x39   :  { %523 = vst.msk [vmem:[#allocation3] sm:$0x1] %vm60_vm0, %v1513_v1  ;;  %526 = vst.msk [vmem:[#allocation3 + $0x11] sm:$0x1] %vm60_vm0, %v1513_v1  ;;  %v81_v6 = vld [vmem:[#allocation7 + $0x8] sm:$0xff]  ;;  %v92_v7 = vld [vmem:[#allocation7 + $0x30] sm:$0xff] }
  0x3a   :  { %527 = vst.msk [vmem:[#allocation3 + $0x12] sm:$0x1] %vm60_vm0, %v1513_v1  ;;  %532 = vst.msk [vmem:[#allocation3 + $0x23] sm:$0x1] %vm60_vm0, %v1513_v1  ;;  %v93_v8 = vld [vmem:[#allocation7 + $0x38] sm:$0xff]  ;;  %v1348_v9 = vpack.c.bf16 %v81_v6, %v80_v4  ;;  %v82_v10 = vld [vmem:[#allocation7 + $0x10] sm:$0xff]  ;;  %1343 = vmatpush3.bf16.msra.mxu0 %v1342_v5 }
  0x3b   :  { %v83_v11 = vld [vmem:[#allocation7 + $0x18] sm:$0xff]  ;;  %v62_v12 = vld [vmem:[#allocation4] sm:$0xff]  ;;  %v1345_v13 = vpack.c.bf16 %v93_v8, %v92_v7  ;;  %v63_v14 = vld [vmem:[#allocation4 + $0x8] sm:$0xff]  ;;  %1344 = vmatprep.subr.bf16.mxu0 %v1511_v0  ;;  %v1666_v55 = vshrl.u32 %v424_v49, 7  ;;  %vm445_vm3 = vcmask 254976   ;;  %vm528_vm4 = vcmask 261122  }
  0x3c   :  { %65 = vst.msk [vmem:[#allocation2 + $0x1] sm:$0xff] %vm64_vm2, %v62_v12  ;;  %1349 = vmatpush3.bf16.msra.mxu1 %v1348_v9  ;;  %v1351_v15 = vpack.c.bf16 %v83_v11, %v82_v10  ;;  %66 = vst.msk [vmem:[#allocation2 + $0x9] sm:$0xff] %vm64_vm2, %v63_v14  ;;  %v70_v16 = vld [vmem:[#allocation4 + $0x10] sm:$0xff]  ;;  %v310_v17 = vld [vmem:[#allocation7 + $0x40] sm:$0xff]  ;;  %vm1061_vm5 = vcmask 113712   ;;  %vm1036_vm6 = vcmask 130112  }
  0x3d   :  { %1350 = vmatprep.subr.bf16.mxu1 %v1511_v0  ;;  %v311_v18 = vld [vmem:[#allocation7 + $0x48] sm:$0xff]  ;;  %72 = vst.msk [vmem:[#allocation2 + $0x13] sm:$0xff] %vm64_vm2, %v70_v16  ;;  %v71_v19 = vld [vmem:[#allocation4 + $0x18] sm:$0xff]  ;;  %v312_v21 = vld [vmem:[#allocation7 + $0x50] sm:$0xff]  ;;  %v426_v61 = vsub.s32 0, %v1666_v55  ;;  %vm1068_vm7 = vcmask 179312  }
  0x3e   :  { %73 = vst.msk [vmem:[#allocation2 + $0x1b] sm:$0xff] %vm64_vm2, %v71_v19  ;;  %1346 = vmatpush3.bf16.msra.mxu0 %v1345_v13  ;;  %v1354_v20 = vpack.c.bf16 %v311_v18, %v310_v17  ;;  %v313_v24 = vld [vmem:[#allocation7 + $0x58] sm:$0xff]  ;;  %v1672_v2 = vld [vmem:[%s1810_s3] sm:$0xff]  ;;  %vm1071_vm8 = vcmask 1040384   ;;  %s1516_s3 = smov [#allocation10]   ;;  %vm1098_vm9 = vcmask 122880  }
  0x3f   :  { %1353 = vmatprep.subr.bf16.mxu0 %v1511_v0  ;;  %v1357_v27 = vpack.c.bf16 %v313_v24, %v312_v21  ;;  %v427_v6 = vrot.slane %v1672_v2, %v426_v61  ;;  %v538_v61 = vld [vmem:[#allocation9] sm:$0xff]  ;;  %s1106_s26 = sshll.u32 %s1516_s3, 4  ;;  %s1107_s26 = int_to_ptr.vmem [resolvable:$true] %s1106_s26 }
  0x40   :  { %1352 = vmatpush3.bf16.msra.mxu1 %v1351_v15  ;;  %s1478_s27 = scalar_lea.vmem %s1107_s26, 32  ;;  %p1483_p11 = scmp.lt.s32.totalorder %s1107_s26, %s1107_s26 }
  0x41   :  { %1359 = vmatprep.subr.bf16.mxu1 %v1511_v0  ;;  %p1479_p10 = scmp.ne.s32.totalorder %s1107_s26, %s1478_s27  ;;  %p1484_p12 = scmp.lt.s32.totalorder %s1478_s27, %s1478_s27 }
  0x43   :  { %v84_v22 = vld [vmem:[#allocation2 + $0x1] sm:$0xff]  ;;  %v85_v25 = vld [vmem:[#allocation2 + $0x9] sm:$0xff]  ;;  %p1485_p13 = por %p1484_p12, %p1483_p11 }
  0x44   :  { %v75_v23 = vld [vmem:[#allocation2] sm:$0xff]  ;;  %1212 = vmatmul.mubr.msk.f32.vlgmr.msra.gmra.mrb[0].mxu0 %vm64_vm2, %v84_v22  ;;  %v76_v26 = vld [vmem:[#allocation2 + $0x8] sm:$0xff]  ;;  %v86_v28 = vld [vmem:[#allocation2 + $0x11] sm:$0xff] }
  0x45   :  { %1235 = vmatmul.mubr.msk.f32.vlgmr.msra.gmra.mrb[0].mxu1 %vm64_vm2, %v75_v23  ;;  %1355 = vmatpush3.bf16.msra.mxu0 %v1354_v20  ;;  %v77_v29 = vld [vmem:[#allocation2 + $0x10] sm:$0xff]  ;;  %v87_v30 = vld [vmem:[#allocation2 + $0x19] sm:$0xff]  ;;  %v88_v32 = vld [vmem:[#allocation2 + $0x21] sm:$0x3]  ;;  %p1486_p0 = pnand %p1485_p13, %p1479_p10 }
  0x46   :  { %1214 = vmatprep.mubr.msk.f32.mxu0 %vm1512_vm1, %v1513_v1  ;;  %1237 = vmatprep.mubr.msk.f32.mxu1 %vm1512_vm1, %v1513_v1  ;;  %v78_v31 = vld [vmem:[#allocation2 + $0x18] sm:$0xff]  ;;  %v79_v33 = vld [vmem:[#allocation2 + $0x20] sm:$0x3]  ;;  %v304_v34 = vld [vmem:[#allocation2 + $0x2] sm:$0xff] }
  0x47   :  { %1356 = vmatprep.subr.bf16.mxu0 %v1511_v0  ;;  %v305_v35 = vld [vmem:[#allocation2 + $0xa] sm:$0xff]  ;;  %v306_v36 = vld [vmem:[#allocation2 + $0x12] sm:$0xff]  ;;  %v307_v37 = vld [vmem:[#allocation2 + $0x1a] sm:$0xff] }
  0x48   :  { %1215 = vmatmul.mubr.msk.f32.gmra.mrb[2].mxu0 %vm64_vm2, %v85_v25  ;;  %v308_v38 = vld [vmem:[#allocation2 + $0x22] sm:$0x3] }
  0x49   :  { %1238 = vmatmul.mubr.msk.f32.gmra.mrb[2].mxu1 %vm64_vm2, %v76_v26  ;;  %1217 = vmatprep.mubr.msk.f32.mxu0 %vm1512_vm1, %v1513_v1 }
  0x4a   :  { %1240 = vmatprep.mubr.msk.f32.mxu1 %vm1512_vm1, %v1513_v1  ;;  %1358 = vmatpush3.bf16.msra.mxu0 %v1357_v27 }
  0x4b   :  { %1365 = vmatprep.subr.bf16.mxu0 %v1511_v0 }
  0x4c   :  { %1218 = vmatmul.mubr.msk.f32.gmra.mrb[4].mxu0 %vm64_vm2, %v86_v28 }
  0x4d   :  { %1241 = vmatmul.mubr.msk.f32.gmra.mrb[4].mxu1 %vm64_vm2, %v77_v29  ;;  %1220 = vmatprep.mubr.msk.f32.mxu0 %vm1512_vm1, %v1513_v1 }
  0x4e   :  { %1243 = vmatprep.mubr.msk.f32.mxu1 %vm1512_vm1, %v1513_v1 }
  0x50   :  { %1221 = vmatmul.mubr.msk.f32.gmra.mrb[6].mxu0 %vm64_vm2, %v87_v30 }
  0x51   :  { %1244 = vmatmul.mubr.msk.f32.gmra.mrb[6].mxu1 %vm64_vm2, %v78_v31  ;;  %1223 = vmatprep.mubr.msk.f32.mxu0 %vm1512_vm1, %v1513_v1 }
  0x52   :  { %1246 = vmatprep.mubr.msk.f32.mxu1 %vm1512_vm1, %v1513_v1 }
  0x54   :  { %1224 = vmatmul.mubr.msk.f32.gmra.mrb[8].mxu0 %vm64_vm2, %v88_v32 }
  0x55   :  { %1247 = vmatmul.mubr.msk.f32.gmra.mrb[8].mxu1 %vm64_vm2, %v79_v33  ;;  %1257 = vmatprep.mubr.msk.f32.mxu0 %vm1512_vm1, %v1513_v1 }
  0x56   :  { %1280 = vmatprep.mubr.msk.f32.mxu1 %vm1512_vm1, %v1513_v1 }
  0x58   :  { %1258 = vmatmul.mubr.msk.f32.vlgmr.msra.gmra.mrb[10].mxu0 %vm64_vm2, %v304_v34 }
  0x59   :  { %1260 = vmatprep.mubr.msk.f32.mxu0 %vm1512_vm1, %v1513_v1 }
  0x5c   :  { %1261 = vmatmul.mubr.msk.f32.gmra.mrb[12].mxu0 %vm64_vm2, %v305_v35 }
  0x5d   :  { %1263 = vmatprep.mubr.msk.f32.mxu0 %vm1512_vm1, %v1513_v1 }
  0x60   :  { %1264 = vmatmul.mubr.msk.f32.gmra.mrb[14].mxu0 %vm64_vm2, %v306_v36 }
  0x61   :  { %1266 = vmatprep.mubr.msk.f32.mxu0 %vm1512_vm1, %v1513_v1 }
  0x64   :  { %1267 = vmatmul.mubr.msk.f32.gmra.mrb[16].mxu0 %vm64_vm2, %v307_v37 }
  0x65   :  { %1269 = vmatprep.mubr.msk.f32.mxu0 %vm1512_vm1, %v1513_v1 }
  0x68   :  { %1270 = vmatmul.mubr.msk.f32.gmra.mrb[18].mxu0 %vm64_vm2, %v308_v38 }
  0x69   :  { %1303 = vmatprep.mubr.msk.f32.mxu0 %vm1512_vm1, %v1513_v1 }
 0x117   :  { %v175_v39 = vpop.f32.mrb[0].mxu0 }
 0x118   :  { %v280_v40 = vpop.f32.mrb[0].mxu1  ;;  %v1213_v41 = vpop.f32.mrb[1].mxu0 }
 0x119   :  { %v281_v42 = vadd.f32 %v280_v40, %v175_v39  ;;  %v1236_v43 = vpop.f32.mrb[1].mxu1 }
 0x11b   :  { %v180_v44 = vpop.f32.mrb[2].mxu0 }
 0x11c   :  { %v285_v45 = vpop.f32.mrb[2].mxu1  ;;  %v1216_v46 = vpop.f32.mrb[3].mxu0 }
 0x11d   :  { %v286_v47 = vadd.f32 %v285_v45, %v180_v44  ;;  %v1239_v48 = vpop.f32.mrb[3].mxu1 }
 0x11f   :  { %v185_v50 = vpop.f32.mrb[4].mxu0 }
 0x120   :  { %v290_v51 = vpop.f32.mrb[4].mxu1  ;;  %v1219_v52 = vpop.f32.mrb[5].mxu0 }
 0x121   :  { %v291_v53 = vadd.f32 %v290_v51, %v185_v50  ;;  %v1242_v54 = vpop.f32.mrb[5].mxu1 }
 0x123   :  { %v190_v56 = vpop.f32.mrb[6].mxu0 }
 0x124   :  { %v295_v57 = vpop.f32.mrb[6].mxu1  ;;  %v1222_v58 = vpop.f32.mrb[7].mxu0 }
 0x125   :  { %v296_v59 = vadd.f32 %v295_v57, %v190_v56  ;;  %v1245_v60 = vpop.f32.mrb[7].mxu1 }
 0x126   :  { %v549_v60 = vld [vmem:[#allocation9 + $0x28] sm:$0xff] }
 0x127   :  { %v195_v62 = vpop.f32.mrb[8].mxu0 }
 0x128   :  { %v300_v63 = vpop.f32.mrb[8].mxu1  ;;  %v1225_v3 = vpop.f32.mrb[9].mxu0 }
 0x129   :  { %v301_v4 = vadd.f32 %v300_v63, %v195_v62  ;;  %v1248_v5 = vpop.f32.mrb[9].mxu1  ;;  %v539_v63 = vld [vmem:[#allocation9 + $0x8] sm:$0xff] }
 0x12a   :  { %v1366_v3 = vpack.c.bf16 %v539_v63, %v538_v61  ;;  %v551_v5 = vld [vmem:[#allocation9 + $0x38] sm:$0xff] }
 0x12b   :  { %v395_v7 = vpop.f32.mrb[10].mxu0 }
 0x12c   :  { %v419_v8 = vadd.f32 %v395_v7, %v281_v42  ;;  %v1259_v9 = vpop.f32.mrb[11].mxu0  ;;  %1367 = vmatpush3.bf16.msra.mxu0 %v1366_v3 }
 0x12d   :  { %1368 = vmatprep.subr.bf16.mxu0 %v1511_v0 }
 0x12e   :  { %v428_v10 = vadd.f32 %v427_v6, %v419_v8  ;;  %v541_v8 = vld [vmem:[#allocation9 + $0x18] sm:$0xff] }
 0x12f   :  { %v400_v11 = vpop.f32.mrb[12].mxu0 }
 0x130   :  { %v420_v12 = vadd.f32 %v400_v11, %v286_v47  ;;  %v1262_v13 = vpop.f32.mrb[13].mxu0  ;;  %v433_v14 = vsel %vm64_vm2, %v428_v10, 0.0 }
 0x131   :  { %434 = vadd.xlane.f32.xlu0 %v433_v14 }
 0x132   :  { %v429_v15 = vadd.f32 %v427_v6, %v420_v12 }
 0x133   :  { %v405_v16 = vpop.f32.mrb[14].mxu0 }
 0x134   :  { %v421_v17 = vadd.f32 %v405_v16, %v291_v53  ;;  %v1265_v18 = vpop.f32.mrb[15].mxu0  ;;  %v436_v19 = vsel %vm64_vm2, %v429_v15, 0.0 }
 0x135   :  { %437 = vadd.xlane.f32.xlu0 %v436_v19  ;;  %v502_v18 = vsub.s32 1, %v1666_v55 }
 0x136   :  { %v430_v20 = vadd.f32 %v427_v6, %v421_v17 }
 0x137   :  { %v410_v21 = vpop.f32.mrb[16].mxu0 }
 0x138   :  { %v422_v22 = vadd.f32 %v410_v21, %v296_v59  ;;  %v1268_v23 = vpop.f32.mrb[17].mxu0  ;;  %v439_v24 = vsel %vm64_vm2, %v430_v20, 0.0  ;;  %v548_v59 = vld [vmem:[#allocation9 + $0x20] sm:$0xff] }
 0x139   :  { %440 = vadd.xlane.f32.xlu1 %v439_v24  ;;  %v1360_v62 = vpack.c.bf16 %v549_v60, %v548_v59  ;;  %v503_v23 = vrot.slane %v1672_v2, %v502_v18  ;;  %v771_v59 = vld [vmem:[#allocation9 + $0x58] sm:$0xff] }
 0x13a   :  { %v431_v25 = vadd.f32 %v427_v6, %v422_v22 }
 0x13b   :  { %v415_v26 = vpop.f32.mrb[18].mxu0  ;;  %1361 = vmatpush3.bf16.msra.mxu1 %v1360_v62 }
 0x13c   :  { %v423_v27 = vadd.f32 %v415_v26, %v301_v4  ;;  %v1271_v28 = vpop.f32.mrb[19].mxu0  ;;  %v442_v29 = vsel %vm64_vm2, %v431_v25, 0.0  ;;  %1362 = vmatprep.subr.bf16.mxu1 %v1511_v0  ;;  %v550_v4 = vld [vmem:[#allocation9 + $0x30] sm:$0xff] }
 0x13d   :  { %443 = vadd.xlane.f32.xlu1 %v442_v29  ;;  %v1363_v7 = vpack.c.bf16 %v551_v5, %v550_v4 }
 0x13e   :  { %v432_v30 = vadd.f32 %v427_v6, %v423_v27  ;;  %v540_v6 = vld [vmem:[#allocation9 + $0x10] sm:$0xff] }
 0x13f   :  { %v1369_v9 = vpack.c.bf16 %v541_v8, %v540_v6  ;;  %1364 = vmatpush3.bf16.msra.mxu1 %v1363_v7 }
 0x140   :  { %v446_v31 = vsel %vm445_vm3, %v432_v30, 0.0  ;;  %1371 = vmatprep.subr.bf16.mxu1 %v1511_v0 }
 0x141   :  { %447 = vadd.xlane.f32.xlu0 %v446_v31  ;;  %1370 = vmatpush3.bf16.msra.mxu0 %v1369_v9 }
 0x1be   :  { %v435_v32 = vpop.xlane.xlu0 %434 }
 0x1bf   :  { %v450_v33 = vmul.f32 0.03125, %v435_v32 }
 0x1c1   :  { %v1680_v34 = vsub.f32 %v428_v10, %v450_v33 }
 0x1c2   :  { %v438_v35 = vpop.xlane.xlu0 %437 }
 0x1c3   :  { %v451_v36 = vmul.f32 0.03125, %v438_v35  ;;  %v460_v37 = vmul.f32 %v1680_v34, %v1680_v34 }
 0x1c5   :  { %v1684_v38 = vsub.f32 %v429_v15, %v451_v36  ;;  %v465_v39 = vsel %vm64_vm2, %v460_v37, 0.0 }
 0x1c6   :  { %v441_v40 = vpop.xlane.xlu1 %440  ;;  %466 = vadd.xlane.f32.xlu1 %v465_v39 }
 0x1c7   :  { %v452_v41 = vmul.f32 0.03125, %v441_v40  ;;  %v461_v42 = vmul.f32 %v1684_v38, %v1684_v38 }
 0x1c9   :  { %v1689_v43 = vsub.f32 %v430_v20, %v452_v41  ;;  %v468_v44 = vsel %vm64_vm2, %v461_v42, 0.0  ;;  %v511_v20 = vsub.s32 2, %v1666_v55 }
 0x1ca   :  { %v444_v45 = vpop.xlane.xlu1 %443  ;;  %469 = vadd.xlane.f32.xlu0 %v468_v44  ;;  %v768_v44 = vld [vmem:[#allocation9 + $0x40] sm:$0xff] }
 0x1cb   :  { %v453_v46 = vmul.f32 0.03125, %v444_v45  ;;  %v462_v47 = vmul.f32 %v1689_v43, %v1689_v43  ;;  %v512_v26 = vrot.slane %v1672_v2, %v511_v20  ;;  %v769_v45 = vld [vmem:[#allocation9 + $0x48] sm:$0xff] }
 0x1cd   :  { %v1694_v48 = vsub.f32 %v431_v25, %v453_v46  ;;  %v471_v50 = vsel %vm64_vm2, %v462_v47, 0.0 }
 0x1ce   :  { %472 = vadd.xlane.f32.xlu1 %v471_v50  ;;  %v448_v51 = vpop.xlane.xlu0 %447 }
 0x1cf   :  { %v454_v52 = vmul.f32 0.03125, %v448_v51  ;;  %v463_v53 = vmul.f32 %v1694_v48, %v1694_v48 }
 0x1d1   :  { %v1699_v54 = vsub.f32 %v432_v30, %v454_v52  ;;  %v474_v56 = vsel %vm64_vm2, %v463_v53, 0.0  ;;  %v770_v53 = vld [vmem:[#allocation9 + $0x50] sm:$0xff] }
 0x1d2   :  { %475 = vadd.xlane.f32.xlu0 %v474_v56  ;;  %v1375_v62 = vpack.c.bf16 %v771_v59, %v770_v53 }
 0x1d3   :  { %v464_v57 = vmul.f32 %v1699_v54, %v1699_v54 }
 0x1d5   :  { %v477_v58 = vsel %vm445_vm3, %v464_v57, 0.0 }
 0x1d6   :  { %478 = vadd.xlane.f32.xlu1 %v477_v58 }
 0x253   :  { %v467_v10 = vpop.xlane.xlu1 %466 }
 0x254   :  { %v480_v11 = vmul.f32 0.03125, %v467_v10 }
 0x256   :  { %v485_v12 = vadd.f32 1e-05, %v480_v11 }
 0x257   :  { %v470_v13 = vpop.xlane.xlu0 %469 }
 0x258   :  { %1392 = vrsqrt.f32 %v485_v12  ;;  %v481_v14 = vmul.f32 0.03125, %v470_v13 }
 0x25a   :  { %v486_v15 = vadd.f32 1e-05, %v481_v14 }
 0x25b   :  { %v473_v16 = vpop.xlane.xlu1 %472 }
 0x25c   :  { %1394 = vrsqrt.f32 %v486_v15  ;;  %v482_v17 = vmul.f32 0.03125, %v473_v16 }
 0x25e   :  { %v487_v19 = vadd.f32 1e-05, %v482_v17 }
 0x25f   :  { %v476_v21 = vpop.xlane.xlu0 %475 }
 0x260   :  { %1396 = vrsqrt.f32 %v487_v19  ;;  %v483_v22 = vmul.f32 0.03125, %v476_v21 }
 0x262   :  { %v1393_v24 = vpop.eup %1392  ;;  %v488_v25 = vadd.f32 1e-05, %v483_v22 }
 0x263   :  { %v495_v27 = vmul.f32 %v1393_v24, %v1680_v34  ;;  %v479_v28 = vpop.xlane.xlu1 %478 }
 0x264   :  { %1398 = vrsqrt.f32 %v488_v25  ;;  %v484_v29 = vmul.f32 0.03125, %v479_v28 }
 0x265   :  { %v504_v30 = vmul.f32 %v503_v23, %v495_v27 }
 0x266   :  { %v1395_v31 = vpop.eup %1394  ;;  %v489_v32 = vadd.f32 1e-05, %v484_v29 }
 0x267   :  { %v513_v33 = vadd.f32 %v512_v26, %v504_v30  ;;  %v496_v35 = vmul.f32 %v1395_v31, %v1684_v38  ;;  %v1372_v38 = vpack.c.bf16 %v769_v45, %v768_v44 }
 0x268   :  { %1400 = vrsqrt.f32 %v489_v32 }
 0x269   :  { %v518_v36 = vmax.f32 %v513_v33, 0.0  ;;  %v505_v37 = vmul.f32 %v503_v23, %v496_v35  ;;  %v884_v35 = vsub.s32 3, %v1666_v55 }
 0x26a   :  { %v1397_v39 = vpop.eup %1396 }
 0x26b   :  { %524 = vst.msk [vmem:[#allocation3 + $0x1] sm:$0xff] %vm64_vm2, %v518_v36  ;;  %v514_v40 = vadd.f32 %v512_v26, %v505_v37  ;;  %v497_v41 = vmul.f32 %v1397_v39, %v1689_v43 }
 0x26d   :  { %v519_v42 = vmax.f32 %v514_v40, 0.0  ;;  %v506_v34 = vmul.f32 %v503_v23, %v497_v41 }
 0x26e   :  { %v1399_v46 = vpop.eup %1398 }
 0x26f   :  { %525 = vst.msk [vmem:[#allocation3 + $0x9] sm:$0xff] %vm64_vm2, %v519_v42  ;;  %v515_v47 = vadd.f32 %v512_v26, %v506_v34  ;;  %v498_v50 = vmul.f32 %v1399_v46, %v1694_v48  ;;  %v885_v42 = vrot.slane %v1672_v2, %v884_v35 }
 0x271   :  { %v520_v51 = vmax.f32 %v515_v47, 0.0  ;;  %v507_v52 = vmul.f32 %v503_v23, %v498_v50 }
 0x272   :  { %v1401_v56 = vpop.eup %1400  ;;  %v542_v57 = vld [vmem:[#allocation3 + $0x1] sm:$0xff] }
 0x273   :  { %v533_v58 = vld [vmem:[#allocation3] sm:$0xff]  ;;  %529 = vst.msk [vmem:[#allocation3 + $0x11] sm:$0xfc] %vm528_vm4, %v520_v51  ;;  %v516_v43 = vadd.f32 %v512_v26, %v507_v52  ;;  %v499_v60 = vmul.f32 %v1401_v56, %v1699_v54  ;;  %1281 = vmatmul.mubr.msk.f32.vlgmr.msra.gmra.mrb[10].mxu1 %vm64_vm2, %v542_v57 }
 0x274   :  { %1304 = vmatmul.mubr.msk.f32.vlgmr.msra.gmra.mrb[20].mxu0 %vm64_vm2, %v533_v58  ;;  %1373 = vmatpush3.bf16.msra.mxu1 %v1372_v38 }
 0x275   :  { %1283 = vmatprep.mubr.msk.f32.mxu1 %vm1512_vm1, %v1513_v1  ;;  %v521_v48 = vmax.f32 %v516_v43, 0.0  ;;  %v508_v61 = vmul.f32 %v503_v23, %v499_v60  ;;  %1306 = vmatprep.mubr.msk.f32.mxu0 %vm1512_vm1, %v1513_v1 }
 0x276   :  { %1374 = vmatprep.subr.bf16.mxu1 %v1511_v0  ;;  %v543_v63 = vld [vmem:[#allocation3 + $0x9] sm:$0xff] }
 0x277   :  { %v534_v3 = vld [vmem:[#allocation3 + $0x8] sm:$0xff]  ;;  %530 = vst.msk [vmem:[#allocation3 + $0x19] sm:$0xff] %vm64_vm2, %v521_v48  ;;  %v517_v54 = vadd.f32 %v512_v26, %v508_v61  ;;  %1284 = vmatmul.mubr.msk.f32.gmra.mrb[12].mxu1 %vm64_vm2, %v543_v63 }
 0x278   :  { %1307 = vmatmul.mubr.msk.f32.gmra.mrb[22].mxu0 %vm64_vm2, %v534_v3  ;;  %1286 = vmatprep.mubr.msk.f32.mxu1 %vm1512_vm1, %v1513_v1  ;;  %v762_v10 = vld [vmem:[#allocation3 + $0x2] sm:$0xff]  ;;  %v763_v11 = vld [vmem:[#allocation3 + $0xa] sm:$0xff] }
 0x279   :  { %1309 = vmatprep.mubr.msk.f32.mxu0 %vm1512_vm1, %v1513_v1  ;;  %v522_v4 = vmax.f32 %v517_v54, 0.0  ;;  %1376 = vmatpush3.bf16.msra.mxu1 %v1375_v62 }
 0x27a   :  { %v544_v5 = vld [vmem:[#allocation3 + $0x11] sm:$0xff] }
 0x27b   :  { %v535_v0 = vld [vmem:[#allocation3 + $0x10] sm:$0xff]  ;;  %531 = vst.msk [vmem:[#allocation3 + $0x21] sm:$0x3] %vm445_vm3, %v522_v4  ;;  %1287 = vmatmul.mubr.msk.f32.gmra.mrb[14].mxu1 %vm64_vm2, %v544_v5 }
 0x27c   :  { %1310 = vmatmul.mubr.msk.f32.gmra.mrb[24].mxu0 %vm64_vm2, %v535_v0  ;;  %1289 = vmatprep.mubr.msk.f32.mxu1 %vm1512_vm1, %v1513_v1 }
 0x27d   :  { %1312 = vmatprep.mubr.msk.f32.mxu0 %vm1512_vm1, %v1513_v1 }
 0x27e   :  { %v545_v6 = vld [vmem:[#allocation3 + $0x19] sm:$0xff] }
 0x27f   :  { %v536_v7 = vld [vmem:[#allocation3 + $0x18] sm:$0xff]  ;;  %1290 = vmatmul.mubr.msk.f32.gmra.mrb[16].mxu1 %vm64_vm2, %v545_v6 }
 0x280   :  { %1313 = vmatmul.mubr.msk.f32.gmra.mrb[26].mxu0 %vm64_vm2, %v536_v7  ;;  %1292 = vmatprep.mubr.msk.f32.mxu1 %vm1512_vm1, %v1513_v1  ;;  %v764_v12 = vld [vmem:[#allocation3 + $0x12] sm:$0xff] }
 0x281   :  { %1315 = vmatprep.mubr.msk.f32.mxu0 %vm1512_vm1, %v1513_v1 }
 0x282   :  { %v546_v8 = vld [vmem:[#allocation3 + $0x21] sm:$0x3] }
 0x283   :  { %v537_v9 = vld [vmem:[#allocation3 + $0x20] sm:$0x3]  ;;  %1293 = vmatmul.mubr.msk.f32.gmra.mrb[18].mxu1 %vm64_vm2, %v546_v8  ;;  %v766_v14 = vld [vmem:[#allocation3 + $0x22] sm:$0x3] }
 0x284   :  { %1316 = vmatmul.mubr.msk.f32.gmra.mrb[28].mxu0 %vm64_vm2, %v537_v9  ;;  %1326 = vmatprep.mubr.msk.f32.mxu1 %vm1512_vm1, %v1513_v1  ;;  %v765_v13 = vld [vmem:[#allocation3 + $0x1a] sm:$0xff] }
 0x287   :  { %1327 = vmatmul.mubr.msk.f32.vlgmr.msra.gmra.mrb[20].mxu1 %vm64_vm2, %v762_v10 }
 0x288   :  { %1329 = vmatprep.mubr.msk.f32.mxu1 %vm1512_vm1, %v1513_v1 }
 0x28b   :  { %1330 = vmatmul.mubr.msk.f32.gmra.mrb[22].mxu1 %vm64_vm2, %v763_v11 }
 0x28c   :  { %1332 = vmatprep.mubr.msk.f32.mxu1 %vm1512_vm1, %v1513_v1 }
 0x28f   :  { %1333 = vmatmul.mubr.msk.f32.gmra.mrb[24].mxu1 %vm64_vm2, %v764_v12 }
 0x290   :  { %1335 = vmatprep.mubr.msk.f32.mxu1 %vm1512_vm1, %v1513_v1 }
 0x293   :  { %1336 = vmatmul.mubr.msk.f32.gmra.mrb[26].mxu1 %vm64_vm2, %v765_v13 }
 0x294   :  { %1338 = vmatprep.mubr.msk.f32.mxu1 %vm1512_vm1, %v1513_v1 }
 0x297   :  { %1339 = vmatmul.mubr.msk.f32.gmra.mrb[28].mxu1 %vm64_vm2, %v766_v14 }
 0x346   :  { %v633_v15 = vpop.f32.mrb[10].mxu1 }
 0x347   :  { %v738_v16 = vpop.f32.mrb[20].mxu0  ;;  %v1282_v18 = vpop.f32.mrb[11].mxu1 }
 0x348   :  { %v739_v17 = vadd.f32 %v738_v16, %v633_v15  ;;  %v1305_v19 = vpop.f32.mrb[21].mxu0 }
 0x34a   :  { %v638_v20 = vpop.f32.mrb[12].mxu1 }
 0x34b   :  { %v743_v21 = vpop.f32.mrb[22].mxu0  ;;  %v1285_v23 = vpop.f32.mrb[13].mxu1 }
 0x34c   :  { %v744_v22 = vadd.f32 %v743_v21, %v638_v20  ;;  %v1308_v24 = vpop.f32.mrb[23].mxu0 }
 0x34e   :  { %v643_v25 = vpop.f32.mrb[14].mxu1 }
 0x34f   :  { %v748_v26 = vpop.f32.mrb[24].mxu0  ;;  %v1288_v28 = vpop.f32.mrb[15].mxu1 }
 0x350   :  { %v749_v27 = vadd.f32 %v748_v26, %v643_v25  ;;  %v1311_v29 = vpop.f32.mrb[25].mxu0 }
 0x352   :  { %v648_v30 = vpop.f32.mrb[16].mxu1 }
 0x353   :  { %v753_v1 = vpop.f32.mrb[26].mxu0  ;;  %v1291_v32 = vpop.f32.mrb[17].mxu1 }
 0x354   :  { %v754_v31 = vadd.f32 %v753_v1, %v648_v30  ;;  %v1314_v33 = vpop.f32.mrb[27].mxu0 }
 0x356   :  { %v653_v36 = vpop.f32.mrb[18].mxu1 }
 0x357   :  { %v758_v37 = vpop.f32.mrb[28].mxu0  ;;  %v1294_v40 = vpop.f32.mrb[19].mxu1 }
 0x358   :  { %v759_v39 = vadd.f32 %v758_v37, %v653_v36  ;;  %v1317_v41 = vpop.f32.mrb[29].mxu0  ;;  %v958_v36 = vsub.s32 4, %v1666_v55  ;;  %v967_v40 = vsub.s32 5, %v1666_v55 }
 0x35a   :  { %v853_v34 = vpop.f32.mrb[20].mxu1 }
 0x35b   :  { %v877_v44 = vadd.f32 %v853_v34, %v739_v17  ;;  %v1328_v45 = vpop.f32.mrb[21].mxu1 }
 0x35d   :  { %v886_v46 = vadd.f32 %v885_v42, %v877_v44 }
 0x35e   :  { %v858_v47 = vpop.f32.mrb[22].mxu1 }
 0x35f   :  { %v878_v50 = vadd.f32 %v858_v47, %v744_v22  ;;  %v1331_v38 = vpop.f32.mrb[23].mxu1  ;;  %v891_v51 = vsel %vm64_vm2, %v886_v46, 0.0 }
 0x360   :  { %892 = vadd.xlane.f32.xlu0 %v891_v51  ;;  %v981_v38 = vsub.s32 6, %v1666_v55 }
 0x361   :  { %v887_v54 = vadd.f32 %v885_v42, %v878_v50  ;;  %v968_v50 = vrot.slane %v1672_v2, %v967_v40 }
 0x362   :  { %v863_v52 = vpop.f32.mrb[24].mxu1 }
 0x363   :  { %v879_v53 = vadd.f32 %v863_v52, %v749_v27  ;;  %v1334_v56 = vpop.f32.mrb[25].mxu1  ;;  %v894_v5 = vsel %vm64_vm2, %v887_v54, 0.0 }
 0x365   :  { %v888_v57 = vadd.f32 %v885_v42, %v879_v53 }
 0x366   :  { %v868_v58 = vpop.f32.mrb[26].mxu1 }
 0x367   :  { %v880_v59 = vadd.f32 %v868_v58, %v754_v31  ;;  %v1337_v43 = vpop.f32.mrb[27].mxu1  ;;  %v897_v60 = vsel %vm64_vm2, %v888_v57, 0.0 }
 0x368   :  { %898 = vadd.xlane.f32.xlu0 %v897_v60 }
 0x369   :  { %v889_v48 = vadd.f32 %v885_v42, %v880_v59  ;;  %v982_v59 = vrot.slane %v1672_v2, %v981_v38 }
 0x36a   :  { %v873_v61 = vpop.f32.mrb[28].mxu1 }
 0x36b   :  { %v881_v62 = vadd.f32 %v873_v61, %v759_v39  ;;  %v1340_v63 = vpop.f32.mrb[29].mxu1  ;;  %v900_v3 = vsel %vm64_vm2, %v889_v48, 0.0 }
 0x36c   :  { %901 = vadd.xlane.f32.xlu1 %v900_v3 }
 0x36d   :  { %v890_v4 = vadd.f32 %v885_v42, %v881_v62  ;;  %v959_v42 = vrot.slane %v1672_v2, %v958_v36 }
 0x36f   :  { %v903_v0 = vsel %vm445_vm3, %v890_v4, 0.0 }
 0x370   :  { %895 = vadd.xlane.f32.xlu1 %v894_v5  ;;  %904 = vadd.xlane.f32.xlu0 %v903_v0 }
 0x3ed   :  { %v893_v6 = vpop.xlane.xlu0 %892 }
 0x3ee   :  { %v906_v7 = vmul.f32 0.03125, %v893_v6 }
 0x3f0   :  { %v911_v8 = vsub.f32 %v886_v46, %v906_v7 }
 0x3f2   :  { %v916_v9 = vmul.f32 %v911_v8, %v911_v8 }
 0x3f4   :  { %v921_v10 = vsel %vm64_vm2, %v916_v9, 0.0 }
 0x3f5   :  { %v899_v11 = vpop.xlane.xlu0 %898  ;;  %922 = vadd.xlane.f32.xlu1 %v921_v10 }
 0x3f6   :  { %v908_v12 = vmul.f32 0.03125, %v899_v11 }
 0x3f8   :  { %v913_v13 = vsub.f32 %v888_v57, %v908_v12 }
 0x3f9   :  { %v902_v14 = vpop.xlane.xlu1 %901 }
 0x3fa   :  { %v909_v15 = vmul.f32 0.03125, %v902_v14  ;;  %v918_v16 = vmul.f32 %v913_v13, %v913_v13 }
 0x3fc   :  { %v914_v17 = vsub.f32 %v889_v48, %v909_v15  ;;  %v927_v18 = vsel %vm64_vm2, %v918_v16, 0.0 }
 0x3fd   :  { %928 = vadd.xlane.f32.xlu1 %v927_v18  ;;  %v896_v19 = vpop.xlane.xlu1 %895  ;;  %v905_v20 = vpop.xlane.xlu0 %904 }
 0x3fe   :  { %v907_v21 = vmul.f32 0.03125, %v896_v19  ;;  %v910_v22 = vmul.f32 0.03125, %v905_v20  ;;  %v919_v23 = vmul.f32 %v914_v17, %v914_v17 }
 0x400   :  { %v912_v24 = vsub.f32 %v887_v54, %v907_v21  ;;  %v915_v25 = vsub.f32 %v890_v4, %v910_v22  ;;  %v930_v26 = vsel %vm64_vm2, %v919_v23, 0.0 }
 0x401   :  { %931 = vadd.xlane.f32.xlu0 %v930_v26 }
 0x402   :  { %v917_v27 = vmul.f32 %v912_v24, %v912_v24  ;;  %v920_v28 = vmul.f32 %v915_v25, %v915_v25 }
 0x404   :  { %v924_v29 = vsel %vm64_vm2, %v917_v27, 0.0  ;;  %v933_v30 = vsel %vm445_vm3, %v920_v28, 0.0  ;;  %v1005_v27 = vsub.s32 7, %v1666_v55 }
 0x405   :  { %925 = vadd.xlane.f32.xlu0 %v924_v29  ;;  %934 = vadd.xlane.f32.xlu1 %v933_v30 }
 0x406   :  { %v1006_v29 = vrot.slane %v1672_v2, %v1005_v27 }
 0x482   :  { %v923_v1 = vpop.xlane.xlu1 %922 }
 0x483   :  { %v936_v31 = vmul.f32 0.03125, %v923_v1 }
 0x485   :  { %v941_v32 = vadd.f32 1e-05, %v936_v31 }
 0x487   :  { %1402 = vrsqrt.f32 %v941_v32 }
 0x48a   :  { %v929_v33 = vpop.xlane.xlu1 %928 }
 0x48b   :  { %v938_v35 = vmul.f32 0.03125, %v929_v33 }
 0x48d   :  { %v943_v37 = vadd.f32 1e-05, %v938_v35 }
 0x48e   :  { %v932_v39 = vpop.xlane.xlu0 %931 }
 0x48f   :  { %1404 = vrsqrt.f32 %v943_v37  ;;  %v939_v41 = vmul.f32 0.03125, %v932_v39 }
 0x491   :  { %v1403_v34 = vpop.eup %1402  ;;  %v944_v44 = vadd.f32 1e-05, %v939_v41 }
 0x492   :  { %v935_v45 = vpop.xlane.xlu1 %934  ;;  %v926_v46 = vpop.xlane.xlu0 %925  ;;  %v951_v47 = vmul.f32 %v1403_v34, %v911_v8 }
 0x493   :  { %1406 = vrsqrt.f32 %v944_v44  ;;  %v940_v51 = vmul.f32 0.03125, %v935_v45  ;;  %v937_v52 = vmul.f32 0.03125, %v926_v46  ;;  %v1026_v45 = vand.u32 127, %v424_v49 }
 0x494   :  { %v960_v53 = vmul.f32 %v959_v42, %v951_v47 }
 0x495   :  { %v945_v56 = vadd.f32 1e-05, %v940_v51  ;;  %v942_v57 = vadd.f32 1e-05, %v937_v52  ;;  %v1056_v46 = vadd.s32 4294967290, %v1026_v45  ;;  %v1051_v38 = vadd.s32 2, %v1026_v45 }
 0x496   :  { %v969_v58 = vadd.f32 %v968_v50, %v960_v53  ;;  %v1063_v51 = vadd.s32 4294967282, %v1026_v45  ;;  %v1515_v52 = vmov 1966171168  }
 0x497   :  { %1408 = vrsqrt.f32 %v945_v56  ;;  %v1075_v53 = vunpack.c.l.s4 %v1515_v52  ;;  %v1059_v56 = vsub.s32 %v1056_v46, %v1666_v55 }
 0x498   :  { %1410 = vrsqrt.f32 %v942_v57  ;;  %v974_v43 = vmax.f32 %v969_v58, 0.0 }
 0x499   :  { %v1405_v60 = vpop.eup %1404  ;;  %v1076_v49 = vunpack.c.0.s8 %v1075_v53 }
 0x49a   :  { %v983_v48 = vmul.f32 %v982_v59, %v974_v43  ;;  %v953_v61 = vmul.f32 %v1405_v60, %v913_v13  ;;  %v1029_v60 = vsub.s32 %v1026_v45, %v1666_v55 }
 0x49c   :  { %v988_v62 = vsel %vm64_vm2, %v983_v48, 0.0  ;;  %v962_v63 = vmul.f32 %v959_v42, %v953_v61  ;;  %v1066_v48 = vsub.s32 %v1063_v51, %v1666_v55 }
 0x49d   :  { %v1407_v3 = vpop.eup %1406  ;;  %989 = vadd.xlane.f32.xlu0 %v988_v62 }
 0x49e   :  { %v971_v54 = vadd.f32 %v968_v50, %v962_v63  ;;  %v954_v4 = vmul.f32 %v1407_v3, %v914_v17 }
 0x4a0   :  { %v976_v5 = vmax.f32 %v971_v54, 0.0  ;;  %v963_v0 = vmul.f32 %v959_v42, %v954_v4  ;;  %v1079_v4 = vsub.s32 %v1076_v49, %v1666_v55 }
 0x4a1   :  { %v1409_v6 = vpop.eup %1408 }
 0x4a2   :  { %v1411_v7 = vpop.eup %1410  ;;  %v985_v8 = vmul.f32 %v982_v59, %v976_v5  ;;  %v972_v9 = vadd.f32 %v968_v50, %v963_v0  ;;  %v955_v10 = vmul.f32 %v1409_v6, %v915_v25  ;;  %v1514_v25 = vmov 0  }
 0x4a3   :  { %v952_v11 = vmul.f32 %v1411_v7, %v912_v24  ;;  %1390 = vset.pattern.permute.xlu1 %v1514_v25  ;;  %1391 = vset.pattern.permute.xlu0 %v1514_v25 }
 0x4a4   :  { %v994_v12 = vsel %vm64_vm2, %v985_v8, 0.0  ;;  %v977_v14 = vmax.f32 %v972_v9, 0.0  ;;  %v964_v15 = vmul.f32 %v959_v42, %v955_v10 }
 0x4a5   :  { %995 = vadd.xlane.f32.xlu0 %v994_v12  ;;  %v961_v13 = vmul.f32 %v959_v42, %v952_v11 }
 0x4a6   :  { %v986_v16 = vmul.f32 %v982_v59, %v977_v14  ;;  %v973_v18 = vadd.f32 %v968_v50, %v964_v15 }
 0x4a7   :  { %v970_v19 = vadd.f32 %v968_v50, %v961_v13  ;;  %v1031_v50 = vadd.s32 4294967288, %v1026_v45 }
 0x4a8   :  { %v997_v20 = vsel %vm64_vm2, %v986_v16, 0.0  ;;  %v978_v17 = vmax.f32 %v973_v18, 0.0 }
 0x4a9   :  { %998 = vadd.xlane.f32.xlu1 %v997_v20  ;;  %v975_v21 = vmax.f32 %v970_v19, 0.0  ;;  %v1034_v58 = vsub.s32 %v1031_v50, %v1666_v55 }
 0x4aa   :  { %v987_v22 = vmul.f32 %v982_v59, %v978_v17 }
 0x4ab   :  { %v984_v23 = vmul.f32 %v982_v59, %v975_v21  ;;  %v1054_v59 = vsub.s32 %v1051_v38, %v1666_v55 }
 0x4ac   :  { %v1000_v26 = vsel %vm445_vm3, %v987_v22, 0.0 }
 0x4ad   :  { %1001 = vadd.xlane.f32.xlu0 %v1000_v26  ;;  %v991_v24 = vsel %vm64_vm2, %v984_v23, 0.0 }
 0x4ae   :  { %992 = vadd.xlane.f32.xlu1 %v991_v24 }
 0x52a   :  { %v990_v28 = vpop.xlane.xlu0 %989 }
 0x52b   :  { %v1007_v31 = vadd.f32 %v1006_v29, %v990_v28 }
 0x52d   :  { %v1012_v36 = vmax.f32 %v1007_v31, 0.0 }
 0x532   :  { %v996_v30 = vpop.xlane.xlu0 %995 }
 0x533   :  { %v1009_v1 = vadd.f32 %v1006_v29, %v996_v30 }
 0x535   :  { %v1014_v32 = vmax.f32 %v1009_v1, 0.0 }
 0x536   :  { %v999_v33 = vpop.xlane.xlu1 %998 }
 0x537   :  { %v1010_v35 = vadd.f32 %v1006_v29, %v999_v33  ;;  %1043 = vperm.xlu1 %1390, %v1014_v32  }
 0x539   :  { %v1015_v37 = vmax.f32 %v1010_v35, 0.0 }
 0x53a   :  { %v1002_v40 = vpop.xlane.xlu0 %1001 }
 0x53b   :  { %v993_v39 = vpop.xlane.xlu1 %992  ;;  %1046 = vperm.xlu0 %1391, %v1015_v37   ;;  %1020 = vperm.xlu1 %1390, %v1012_v36   ;;  %v1011_v34 = vadd.f32 %v1006_v29, %v1002_v40 }
 0x53c   :  { %v1008_v41 = vadd.f32 %v1006_v29, %v993_v39 }
 0x53d   :  { %v1016_v44 = vmax.f32 %v1011_v34, 0.0 }
 0x53e   :  { %v1013_v42 = vmax.f32 %v1008_v41, 0.0 }
 0x540   :  { %1023 = vperm.xlu1 %1390, %v1013_v42  }
 0x544   :  { %1049 = vperm.xlu1 %1390, %v1016_v44  }
 0x5b6   :  { %v1044_v2 = vpop.permute.xlu1 %1043 }
 0x5b7   :  { %v1055_v63 = vrot.slane %v1044_v2, %v1054_v59 }
 0x5ba   :  { %v1021_v47 = vpop.permute.xlu1 %1020  ;;  %v1047_v57 = vpop.permute.xlu0 %1046 }
 0x5bb   :  { %v1060_v61 = vrot.slane %v1047_v57, %v1059_v56  ;;  %v1030_v54 = vrot.slane %v1021_v47, %v1029_v60 }
 0x5bd   :  { %v1062_v0 = vsel %vm1061_vm5, %v1060_v61, %v1055_v63 }
 0x5bf   :  { %v1024_v43 = vpop.permute.xlu1 %1023 }
 0x5c0   :  { %v1035_v62 = vrot.slane %v1024_v43, %v1034_v58 }
 0x5c2   :  { %v1037_v6 = vsel %vm1036_vm6, %v1035_v62, %v1030_v54 }
 0x5c3   :  { %v1050_v3 = vpop.permute.xlu1 %1049 }
 0x5c4   :  { %v1067_v5 = vrot.slane %v1050_v3, %v1066_v48 }
 0x5c6   :  { %v1069_v7 = vsel %vm1068_vm7, %v1067_v5, %v1062_v0 }
 0x5c7   :  { %v1072_v8 = vsel %vm1071_vm8, %v1037_v6, %v1069_v7 }
 0x5c8   :  { %v1080_v9 = vrot.slane %v1072_v8, %v1079_v4 }
 0x5ca   :  { %v1081_v10 = vcombine.high %v1080_v9, %v1080_v9  ;;  %v1088_v11 = vrot.slane %v1080_v9, %v1079_v4 }
 0x5cc   :  { %v1095_v12 = vrot.slane %v1081_v10, %v1079_v4  ;;  %1099 = vst.msk [vmem:[#allocation10] sm:$0x1] %vm1098_vm9, %v1088_v11 }
 0x5ce   :  { %1100 = vst.msk [vmem:[#allocation10 + $0x1] sm:$0x1] %vm1098_vm9, %v1095_v12 }
 0x5cf   :  { %1489 = shalt.err (!%p1486_p0)
}
 0x5d0   :  { %s1490_s30 = scalar_lea.hbm %s1811_s4, 32 }
 0x5d1   :  { %p1491_p1 = scmp.ne.s32.totalorder %s1811_s4, %s1490_s30  ;;  %p1494_p2 = scmp.lt.u32.totalorder %s1490_s30, %s1811_s4 }
 0x5d3   :  { %p1496_p3 = pnand %p1494_p2, %p1491_p1 }
 0x5d5   :  { %1499 = shalt.err (!%p1496_p3)
}
 0x5d6   :  { %s1517_s9 = smov 16   ;;  %s1518_s10 = smov 1  }
 0x5d7   :  { %1112 = dma.vmem_to_hbm [thread:$0]  %s1107_s26, 32, %s1811_s4, [#allocation6], %s1517_s9, %s1517_s9, %s1518_s10  }
 0x5d8   :  { %1504 = dma.done.wait [#allocation6], 32  }
 0x5d9   :  { %1505 = vsyncadd [#allocation6], 4294967264 }
 0x5da   :  { %1116 = vsyncpa [#allocation5], 1 }
 0x5db   :  { %1117 = vsyncpa [#allocation8], 1 }
 0x5dc   :  { %1118 = vsyncpa [#allocation6], 1 }

</bundles_post_ra>
